<compile_context>
chip_gen: v5e
topology: v5e:2x2
jax: 0.10.0
libtpu: 0.0.40
codegen_flags: <defaults>
</compile_context>

<pallas_src>
import jax
import jax.numpy as jnp
from jax.experimental import pallas as pl
from jax.experimental.pallas import tpu as pltpu


def _round_up(x, m):
    return (x + m - 1) // m * m


def _impute_train_kernel(x_ref, wt_ref, b_ref, mask_ref, pred_ref, imp_ref):
    x = x_ref[...]                                        # (TR, Npad)
    # prediction = x @ W^T + bias (W^T passed in pre-transposed, padded)
    pred = jnp.dot(x, wt_ref[...],
                   preferred_element_type=jnp.float32) + b_ref[...]
    x_clean = jnp.where(jnp.isnan(x), jnp.zeros_like(x), x)
    keep = 1.0 - mask_ref[...]                            # mask passed as 0/1 f32
    pred_ref[...] = pred.astype(pred_ref.dtype)
    imp_ref[...] = (pred * keep + x_clean).astype(imp_ref.dtype)


def _impute_infer_kernel(x_ref, wt_ref, b_ref, mask_ref, imp_ref):
    x = x_ref[...]
    pred = jnp.dot(x, wt_ref[...],
                   preferred_element_type=jnp.float32) + b_ref[...]
    x_clean = jnp.where(jnp.isnan(x), jnp.zeros_like(x), x)
    keep = 1.0 - mask_ref[...]
    imp_ref[...] = (pred * keep + x_clean).astype(imp_ref.dtype)


def linear_impute(x, mask, weight, bias, temporal=False, training=True):
    """x, mask: (B, S, N, 1). weight: (N, N) (PyTorch Linear layout), bias: (N,)."""
    if temporal:
        # rearrange 'b s n c -> b n s c' (pure glue)
        x = jnp.transpose(x, (0, 2, 1, 3))
        mask = jnp.transpose(mask, (0, 2, 1, 3))

    B, S, N, C = x.shape
    assert C == 1, "channel dim must be 1 (it is squeezed away in the reference)"
    R = B * S

    # ---- padding / tiling decisions -------------------------------------
    Npad = _round_up(N, 128)                  # lane-dense last dim
    TR = min(1024, _round_up(R, 8))           # row tile, multiple of 8
    Rpad = _round_up(R, TR)                   # pad rows so every block is full
    grid = (Rpad // TR,)

    x2 = x.reshape(R, N).astype(jnp.float32)
    m2 = mask.reshape(R, N).astype(jnp.float32)
    wt = weight.T.astype(jnp.float32)         # kernel computes x @ W^T
    b2 = bias.reshape(1, N).astype(jnp.float32)

    x2 = jnp.pad(x2, ((0, Rpad - R), (0, Npad - N)))
    m2 = jnp.pad(m2, ((0, Rpad - R), (0, Npad - N)))
    wt = jnp.pad(wt, ((0, Npad - N), (0, Npad - N)))
    b2 = jnp.pad(b2, ((0, 0), (0, Npad - N)))

    # ---- VMEM budget: streamed tiles (double-buffered) + resident weight --
    tile_bytes = TR * Npad * 4
    n_streams = 4 if training else 3          # x, mask + (pred?, imp)
    resident_bytes = (Npad * Npad + Npad) * 4
    vmem_limit = 2 * n_streams * tile_bytes + 2 * resident_bytes + (16 << 20)
    vmem_limit = int(min(vmem_limit, 48 << 20))

    row_spec = pl.BlockSpec((TR, Npad), lambda i: (i, 0))
    w_spec = pl.BlockSpec((Npad, Npad), lambda i: (0, 0))
    b_spec = pl.BlockSpec((1, Npad), lambda i: (0, 0))

    compiler_params = pltpu.CompilerParams(
        dimension_semantics=("parallel",),
        vmem_limit_bytes=vmem_limit,
    )

    if training:
        pred2, imp2 = pl.pallas_call(
            _impute_train_kernel,
            out_shape=(jax.ShapeDtypeStruct((Rpad, Npad), jnp.float32),
                       jax.ShapeDtypeStruct((Rpad, Npad), jnp.float32)),
            grid=grid,
            in_specs=[row_spec, w_spec, b_spec, row_spec],
            out_specs=(row_spec, row_spec),
            compiler_params=compiler_params,
        )(x2, wt, b2, m2)

        predictions = pred2[:R, :N].reshape(B, S, N, 1)
        imputations = imp2[:R, :N].reshape(B, S, N, 1)
        if temporal:
            predictions = jnp.transpose(predictions, (0, 2, 1, 3))
            imputations = jnp.transpose(imputations, (0, 2, 1, 3))
        return imputations, predictions

    imp2 = pl.pallas_call(
        _impute_infer_kernel,
        out_shape=jax.ShapeDtypeStruct((Rpad, Npad), jnp.float32),
        grid=grid,
        in_specs=[row_spec, w_spec, b_spec, row_spec],
        out_specs=row_spec,
        compiler_params=compiler_params,
    )(x2, wt, b2, m2)

    imputations = imp2[:R, :N].reshape(B, S, N, 1)
    if temporal:
        imputations = jnp.transpose(imputations, (0, 2, 1, 3))
    return imputations


def _reference(x, mask, weight, bias):
    # plain-JAX mirror of the PyTorch loop, for verification
    pred = jnp.einsum("bsn,mn->bsm", x[..., 0], weight) + bias
    pred = pred[..., None]
    x_clean = jnp.nan_to_num(x)
    imp = pred * (1.0 - mask.astype(jnp.float32)) + x_clean
    return imp, pred


if __name__ == "__main__":
    key = jax.random.PRNGKey(0)
    B, S, N, C = 2, 8, 32, 1          # seq_dim = N = 32
    k_x, k_m, k_w, k_b = jax.random.split(key, 4)

    x = jax.random.normal(k_x, (B, S, N, C), dtype=jnp.float32)
    mask = jax.random.bernoulli(k_m, 0.5, (B, S, N, C))        # True = observed

    # deterministic nn.Linear(N, N) init: U(-1/sqrt(N), 1/sqrt(N))
    bound = 1.0 / jnp.sqrt(jnp.float32(N))
    weight = jax.random.uniform(k_w, (N, N), jnp.float32, -bound, bound)
    bias = jax.random.uniform(k_b, (N,), jnp.float32, -bound, bound)

    # training path: two outputs
    imputations, predictions = linear_impute(x, mask, weight, bias,
                                             temporal=False, training=True)
    jax.block_until_ready((imputations, predictions))

    imp_ref, pred_ref = _reference(x, mask, weight, bias)
    assert imputations.shape == (B, S, N, 1)
    assert predictions.shape == (B, S, N, 1)
    assert jnp.allclose(predictions, pred_ref, atol=1e-5, rtol=1e-5)
    assert jnp.allclose(imputations, imp_ref, atol=1e-5, rtol=1e-5)

    # inference path: single output (no pred slab stored)
    imp_only = linear_impute(x, mask, weight, bias, temporal=False, training=False)
    jax.block_until_ready(imp_only)
    assert jnp.allclose(imp_only, imp_ref, atol=1e-5, rtol=1e-5)

    # temporal=True path (S == N here so the transposed Linear is well-formed)
    imp_t, pred_t = linear_impute(
        jax.random.normal(k_x, (B, N, N, C), dtype=jnp.float32),
        jax.random.bernoulli(k_m, 0.5, (B, N, N, C)),
        weight, bias, temporal=True, training=True)
    jax.block_until_ready((imp_t, pred_t))
    assert imp_t.shape == (B, N, N, 1) and pred_t.shape == (B, N, N, 1)

    print("KERNEL_OK")
</pallas_src>

<mosaic_0001>
module attributes {stable_mosaic.version = 11 : i64} {
  func.func @_impute_train_kernel(%arg0: i32, %arg1: memref<16x128xf32, #tpu.memory_space<vmem>>, %arg2: memref<128x128xf32, #tpu.memory_space<vmem>>, %arg3: memref<1x128xf32, #tpu.memory_space<vmem>>, %arg4: memref<16x128xf32, #tpu.memory_space<vmem>>, %arg5: memref<16x128xf32, #tpu.memory_space<vmem>>, %arg6: memref<16x128xf32, #tpu.memory_space<vmem>>) attributes {dimension_semantics = [#tpu.dimension_semantics<parallel>], iteration_bounds = array<i64: 1>, scalar_prefetch = 0 : i64, scratch_operands = 0 : i64, tpu.core_type = #tpu.core_type<tc>, window_params = [{transform_indices = @transform_0, window_bounds = array<i64: 16, 128>}, {pipeline_mode = #tpu.pipeline_mode<synchronous>, transform_indices = @transform_1, window_bounds = array<i64: 128, 128>}, {pipeline_mode = #tpu.pipeline_mode<synchronous>, transform_indices = @transform_2, window_bounds = array<i64: 1, 128>}, {transform_indices = @transform_3, window_bounds = array<i64: 16, 128>}, {transform_indices = @transform_4, window_bounds = array<i64: 16, 128>}, {transform_indices = @transform_5, window_bounds = array<i64: 16, 128>}]} {
    %c0 = arith.constant 0 : index
    %c0_0 = arith.constant 0 : index
    %0 = vector.load %arg1[%c0, %c0_0] : memref<16x128xf32, #tpu.memory_space<vmem>>, vector<16x128xf32>
    %c0_1 = arith.constant 0 : index
    %c0_2 = arith.constant 0 : index
    %1 = vector.load %arg2[%c0_1, %c0_2] : memref<128x128xf32, #tpu.memory_space<vmem>>, vector<128x128xf32>
    %cst = arith.constant dense<0.000000e+00> : vector<16x128xf32>
    %2 = tpu.matmul %0, %1, %cst {dimension_numbers = #tpu.dot_dimension_numbers<[1], [0], [0], [1], [0, 0, 1, 1], [], []>} : vector<16x128xf32>, vector<128x128xf32>, vector<16x128xf32> -> vector<16x128xf32>
    %c0_3 = arith.constant 0 : index
    %c0_4 = arith.constant 0 : index
    %3 = vector.load %arg3[%c0_3, %c0_4] : memref<1x128xf32, #tpu.memory_space<vmem>>, vector<1x128xf32>
    %4 = vector.broadcast %3 : vector<1x128xf32> to vector<16x128xf32>
    %5 = arith.addf %2, %4 : vector<16x128xf32>
    %6 = arith.cmpf one, %0, %0 : vector<16x128xf32>
    %cst_5 = arith.constant 0.000000e+00 : f32
    %7 = vector.broadcast %cst_5 : f32 to vector<16x128xf32>
    %8 = arith.select %6, %7, %0 : vector<16x128xi1>, vector<16x128xf32>
    %c0_6 = arith.constant 0 : index
    %c0_7 = arith.constant 0 : index
    %9 = vector.load %arg4[%c0_6, %c0_7] : memref<16x128xf32, #tpu.memory_space<vmem>>, vector<16x128xf32>
    %cst_8 = arith.constant 1.000000e+00 : f32
    %10 = vector.broadcast %cst_8 : f32 to vector<16x128xf32>
    %11 = arith.subf %10, %9 : vector<16x128xf32>
    %c0_9 = arith.constant 0 : index
    %c0_10 = arith.constant 0 : index
    %12 = vector.load %arg5[%c0_9, %c0_10] : memref<16x128xf32, #tpu.memory_space<vmem>>, vector<16x128xf32>
    tpu.vector_store %arg5[%c0_9, %c0_10], %5 {strides = array<i32>} : memref<16x128xf32, #tpu.memory_space<vmem>>, vector<16x128xf32>,
    %13 = arith.mulf %5, %11 : vector<16x128xf32>
    %14 = arith.addf %13, %8 : vector<16x128xf32>
    %c0_11 = arith.constant 0 : index
    %c0_12 = arith.constant 0 : index
    %15 = vector.load %arg6[%c0_11, %c0_12] : memref<16x128xf32, #tpu.memory_space<vmem>>, vector<16x128xf32>
    tpu.vector_store %arg6[%c0_11, %c0_12], %14 {strides = array<i32>} : memref<16x128xf32, #tpu.memory_space<vmem>>, vector<16x128xf32>,
    return
  }
  func.func @transform_0(%arg0: i32) -> (i32, i32) {
    %c0_i32 = arith.constant 0 : i32
    %c0_i32_0 = arith.constant 0 : i32
    return %arg0, %c0_i32 : i32, i32
  }
  func.func @transform_1(%arg0: i32) -> (i32, i32) {
    %c0_i32 = arith.constant 0 : i32
    %c0_i32_0 = arith.constant 0 : i32
    %c0_i32_1 = arith.constant 0 : i32
    return %c0_i32, %c0_i32_0 : i32, i32
  }
  func.func @transform_2(%arg0: i32) -> (i32, i32) {
    %c0_i32 = arith.constant 0 : i32
    %c0_i32_0 = arith.constant 0 : i32
    %c0_i32_1 = arith.constant 0 : i32
    return %c0_i32, %c0_i32_0 : i32, i32
  }
  func.func @transform_3(%arg0: i32) -> (i32, i32) {
    %c0_i32 = arith.constant 0 : i32
    %c0_i32_0 = arith.constant 0 : i32
    return %arg0, %c0_i32 : i32, i32
  }
  func.func @transform_4(%arg0: i32) -> (i32, i32) {
    %c0_i32 = arith.constant 0 : i32
    %c0_i32_0 = arith.constant 0 : i32
    return %arg0, %c0_i32 : i32, i32
  }
  func.func @transform_5(%arg0: i32) -> (i32, i32) {
    %c0_i32 = arith.constant 0 : i32
    %c0_i32_0 = arith.constant 0 : i32
    return %arg0, %c0_i32 : i32, i32
  }
}

</mosaic_0001>

<bundles_post_ra>
// kernel: tpu_custom_call.1
= control target key start
LH: loop header
LB: loop body
LE: loop exit
PB: predicated region body
PF: predicated region fallthrough
CT: control target
= control target key end

     0   :  { %11 = vsyncpa [#allocation3], 0  ;;  %s389_s0 = inlined_call_operand.hbm [shape: f32[16,128], index: 0, kind: input, shape index: {}]   ;;  %s390_s1 = inlined_call_operand.hbm [shape: f32[128,128], index: 1, kind: input, shape index: {}]   ;;  %s391_s2 = inlined_call_operand.vmem [shape: f32[1,128], index: 2, kind: input, shape index: {}]   ;;  %s392_s3 = inlined_call_operand.hbm [shape: f32[16,128], index: 3, kind: input, shape index: {}]   ;;  %s393_s4 = inlined_call_operand.hbm [shape: f32[16,128], index: 4, kind: output, shape index: {0}]   ;;  %s394_s5 = inlined_call_operand.hbm [shape: f32[16,128], index: 5, kind: output, shape index: {1}]  }
   0x1   :  { %12 = vsyncpa [#allocation6], 0 }
   0x2   :  { %13 = vsyncpa [#allocation4], 0 }
   0x3   :  { %14 = vsyncpa [#allocation10], 0  ;;  %s32_s20 = sshll.u32 %s390_s1, 4  ;;  %s319_s21 = smov [#allocation5]   ;;  %s33_s20 = int_to_ptr.hbm [resolvable:$true] %s32_s20 }
   0x4   :  { %s34_s22 = sshll.u32 %s319_s21, 4  ;;  %s19_s25 = sshll.u32 %s389_s0, 4  ;;  %s35_s22 = int_to_ptr.vmem [resolvable:$true] %s34_s22  ;;  %s20_s25 = int_to_ptr.hbm [resolvable:$true] %s19_s25 }
   0x5   :  { %s320_s26 = smov 128   ;;  %s321_s27 = smov 8  }
   0x6   :  { %40 = dma.hbm_to_vmem [thread:$0]  %s33_s20, 2048, %s35_s22, [#allocation6], %s320_s26, %s320_s26, %s321_s27  }
   0x7   :  { %s322_s28 = smov [#allocation2]   ;;  %s47_s1 = sshll.u32 %s392_s3, 4  ;;  %s48_s1 = int_to_ptr.hbm [resolvable:$true] %s47_s1 }
   0x8   :  { %s21_s29 = sshll.u32 %s322_s28, 4  ;;  %s323_s0 = smov [#allocation7]   ;;  %s22_s29 = int_to_ptr.vmem [resolvable:$true] %s21_s29 }
   0x9   :  { %27 = dma.hbm_to_vmem [thread:$0]  %s20_s25, 256, %s22_s29, [#allocation3], %s320_s26, %s320_s26, %s321_s27  }
   0xa   :  { %s49_s7 = sshll.u32 %s323_s0, 4  ;;  %s50_s7 = int_to_ptr.vmem [resolvable:$true] %s49_s7 }
   0xb   :  { %55 = dma.hbm_to_vmem [thread:$0]  %s48_s1, 256, %s50_s7, [#allocation6], %s320_s26, %s320_s26, %s321_s27  }
   0xc   :  { %311 = dma.done.wait [#allocation3], 256  }
   0xd   :  { %312 = vsyncadd [#allocation3], 4294967040 }
   0xe   :  { %313 = dma.done.wait [#allocation6], 2304  }
   0xf   :  { %314 = vsyncadd [#allocation6], 4294964992  ;;  %v85_v0 = vld [vmem:[#allocation5 + $0x78] sm:$0xff]  ;;  %v84_v1 = vld [vmem:[#allocation5 + $0x70] sm:$0xff]  ;;  %s324_s9 = smov [#allocation8]   ;;  %s135_s13 = sshll.u32 %s393_s4, 4  ;;  %s136_s13 = int_to_ptr.hbm [resolvable:$true] %s135_s13 }
  0x10   :  { %90 = vmatpush.msra.mxu0 %v85_v0  ;;  %167 = vmatpush.msra.mxu1 %v85_v0  ;;  %v83_v2 = vld [vmem:[#allocation5 + $0x68] sm:$0xff]  ;;  %v82_v3 = vld [vmem:[#allocation5 + $0x60] sm:$0xff]  ;;  %v81_v4 = vld [vmem:[#allocation5 + $0x58] sm:$0xff]  ;;  %s133_s10 = sshll.u32 %s324_s9, 4  ;;  %s148_s17 = sshll.u32 %s394_s5, 4  ;;  %s134_s10 = int_to_ptr.vmem [resolvable:$true] %s133_s10  ;;  %s149_s17 = int_to_ptr.hbm [resolvable:$true] %s148_s17 }
  0x11   :  { %v80_v5 = vld [vmem:[#allocation5 + $0x50] sm:$0xff]  ;;  %v79_v6 = vld [vmem:[#allocation5 + $0x48] sm:$0xff]  ;;  %v78_v7 = vld [vmem:[#allocation5 + $0x40] sm:$0xff] }
  0x12   :  { %91 = vmatpush.msra.mxu0 %v84_v1  ;;  %168 = vmatpush.msra.mxu1 %v84_v1  ;;  %v77_v8 = vld [vmem:[#allocation5 + $0x38] sm:$0xff]  ;;  %v76_v9 = vld [vmem:[#allocation5 + $0x30] sm:$0xff]  ;;  %v75_v10 = vld [vmem:[#allocation5 + $0x28] sm:$0xff] }
  0x13   :  { %v74_v11 = vld [vmem:[#allocation5 + $0x20] sm:$0xff]  ;;  %v73_v12 = vld [vmem:[#allocation5 + $0x18] sm:$0xff]  ;;  %v72_v13 = vld [vmem:[#allocation5 + $0x10] sm:$0xff] }
  0x14   :  { %92 = vmatpush.msra.mxu0 %v83_v2  ;;  %169 = vmatpush.msra.mxu1 %v83_v2  ;;  %v71_v14 = vld [vmem:[#allocation5 + $0x8] sm:$0xff]  ;;  %v70_v15 = vld [vmem:[#allocation5] sm:$0xff]  ;;  %v68_v16 = vld [vmem:[#allocation2] sm:$0xff] }
  0x15   :  { %v69_v17 = vld [vmem:[#allocation2 + $0x8] sm:$0xff]  ;;  %v117_v18 = vld [vmem:[#allocation7] sm:$0xff]  ;;  %v118_v19 = vld [vmem:[#allocation7 + $0x8] sm:$0xff]  ;;  %vm113_vm0 = vcmp.ne.f32.partialorder %v68_v16, %v68_v16 }
  0x16   :  { %93 = vmatpush.msra.mxu0 %v82_v3  ;;  %170 = vmatpush.msra.mxu1 %v82_v3  ;;  %v190_v20 = vld [vmem:[%s391_s2] ss:$0 sm:$0xff]  ;;  %vm114_vm1 = vcmp.ne.f32.partialorder %v69_v17, %v69_v17  ;;  %v119_v21 = vsub.f32 1.0, %v117_v18  ;;  %v120_v22 = vsub.f32 1.0, %v118_v19  ;;  %v115_v27 = vsel %vm113_vm0, 0.0, %v68_v16  ;;  %s325_s2 = smov [#allocation9]  }
  0x17   :  { %v116_v28 = vsel %vm114_vm1, 0.0, %v69_v17  ;;  %s146_s14 = sshll.u32 %s325_s2, 4  ;;  %s147_s14 = int_to_ptr.vmem [resolvable:$true] %s146_s14 }
  0x18   :  { %94 = vmatpush.msra.mxu0 %v81_v4  ;;  %171 = vmatpush.msra.mxu1 %v81_v4 }
  0x1a   :  { %95 = vmatpush.msra.mxu0 %v80_v5  ;;  %172 = vmatpush.msra.mxu1 %v80_v5 }
  0x1c   :  { %96 = vmatpush.msra.mxu0 %v79_v6  ;;  %173 = vmatpush.msra.mxu1 %v79_v6 }
  0x1e   :  { %97 = vmatpush.msra.mxu0 %v78_v7  ;;  %174 = vmatpush.msra.mxu1 %v78_v7 }
  0x20   :  { %98 = vmatpush.msra.mxu0 %v77_v8  ;;  %175 = vmatpush.msra.mxu1 %v77_v8 }
  0x22   :  { %99 = vmatpush.msra.mxu0 %v76_v9  ;;  %176 = vmatpush.msra.mxu1 %v76_v9 }
  0x24   :  { %100 = vmatpush.msra.mxu0 %v75_v10  ;;  %177 = vmatpush.msra.mxu1 %v75_v10 }
  0x26   :  { %101 = vmatpush.msra.mxu0 %v74_v11  ;;  %178 = vmatpush.msra.mxu1 %v74_v11 }
  0x28   :  { %102 = vmatpush.msra.mxu0 %v73_v12  ;;  %179 = vmatpush.msra.mxu1 %v73_v12 }
  0x2a   :  { %103 = vmatpush.msra.mxu0 %v72_v13  ;;  %180 = vmatpush.msra.mxu1 %v72_v13 }
  0x2c   :  { %104 = vmatpush.msra.mxu0 %v71_v14  ;;  %181 = vmatpush.msra.mxu1 %v71_v14 }
  0x2e   :  { %105 = vmatpush.msra.mxu0 %v70_v15  ;;  %182 = vmatpush.msra.mxu1 %v70_v15 }
  0x2f   :  { %106 = vmatmul.f32.vlgmr.msra.gmra.mxu0 %v68_v16  ;;  %109 = vmatmul.f32.vlgmr.msra.gmra.mxu1 %v69_v17 }
  0xac   :  { %v107_v23 = vpop.f32.mrf.mxu0  ;;  %v110_v24 = vpop.f32.mrf.mxu1 }
  0xad   :  { %v108_v25 = vadd.f32 %v190_v20, %v107_v23  ;;  %v111_v26 = vadd.f32 %v190_v20, %v110_v24 }
  0xaf   :  { %121 = vst [vmem:[#allocation8] sm:$0xff] %v108_v25  ;;  %v123_v29 = vmul.f32 %v119_v21, %v108_v25  ;;  %v124_v30 = vmul.f32 %v120_v22, %v111_v26 }
  0xb0   :  { %122 = vst [vmem:[#allocation8 + $0x8] sm:$0xff] %v111_v26 }
  0xb1   :  { %v125_v31 = vadd.f32 %v123_v29, %v115_v27  ;;  %v126_v32 = vadd.f32 %v124_v30, %v116_v28  ;;  %141 = dma.vmem_to_hbm [thread:$0]  %s134_s10, 256, %s136_s13, [#allocation4], %s320_s26, %s320_s26, %s321_s27  }
  0xb3   :  { %127 = vst [vmem:[#allocation9] sm:$0xff] %v125_v31 }
  0xb4   :  { %128 = vst [vmem:[#allocation9 + $0x8] sm:$0xff] %v126_v32 }
  0xb5   :  { %154 = dma.vmem_to_hbm [thread:$0]  %s147_s14, 256, %s149_s17, [#allocation10], %s320_s26, %s320_s26, %s321_s27  }
  0xb6   :  { %315 = dma.done.wait [#allocation4], 256  }
  0xb7   :  { %316 = vsyncadd [#allocation4], 4294967040 }
  0xb8   :  { %317 = dma.done.wait [#allocation10], 256  }
  0xb9   :  { %318 = vsyncadd [#allocation10], 4294967040 }
  0xba   :  { %163 = vsyncpa [#allocation3], 1 }
  0xbb   :  { %164 = vsyncpa [#allocation6], 1 }
  0xbc   :  { %165 = vsyncpa [#allocation4], 1 }
  0xbd   :  { %166 = vsyncpa [#allocation10], 1 }

</bundles_post_ra>
